<compile_context>
chip_gen: v6e
topology: v6e:2x2x1
jax: 0.10.0
libtpu: 0.0.40
codegen_flags: <defaults>
</compile_context>

<pallas_src>
import functools

import jax
import jax.numpy as jnp
from jax import lax
from jax.experimental import pallas as pl
from jax.experimental.pallas import tpu as pltpu


# ----------------------------------------------------------------------------
# Helpers
# ----------------------------------------------------------------------------
def _round_up(n, m):
    return (n + m - 1) // m * m


def _pick_row_tile(m_rows, row_tile=512):
    # Multiple-of-8 row tile.  Keep >= 2 grid steps whenever there is enough work
    # so the "parallel" row axis can be sharded across v7x's two TensorCores.
    mp = _round_up(m_rows, 8)
    tm = min(row_tile, mp)
    if 16 <= mp <= row_tile:
        tm = _round_up(mp // 2, 8)
    return tm


def _pad_rows(x2d, mp):
    m = x2d.shape[0]
    if mp != m:
        x2d = jnp.pad(x2d, ((0, mp - m), (0, 0)))
    return x2d


def _pick_ssd_chunk(L, d_conv):
    # Chunked SSD keeps the quadratic intra-chunk work O(H*L*Lc) and the VMEM
    # working set bounded; Lc<=128 fits v7x's 64 MiB comfortably (v5e/v6e could
    # use 256).
    for c in (128, 64, 32, 16, 8):
        if c <= L and L % c == 0 and c >= d_conv:
            return c
    return L  # TODO(synk): ragged / very short sequences fall back to one chunk.


# ----------------------------------------------------------------------------
# Kernel 1: LayerNorm1 fused into in_proj (three matmul outputs: z, xBC, dt)
# ----------------------------------------------------------------------------
def _ln_inproj_kernel(x_ref, g_ref, b_ref, wz_ref, wxbc_ref, wdt_ref,
                      z_ref, xbc_ref, dt_ref, *, eps):
    x = x_ref[...].astype(jnp.float32)
    mu = jnp.mean(x, axis=-1, keepdims=True)
    xc = x - mu
    var = jnp.mean(xc * xc, axis=-1, keepdims=True)
    xn = xc * lax.rsqrt(var + eps)
    xn = xn * g_ref[...].astype(jnp.float32) + b_ref[...].astype(jnp.float32)
    xn_mxu = xn.astype(wz_ref.dtype)                 # bf16 operands for the MXU
    z_ref[...] = jnp.dot(xn_mxu, wz_ref[...],
                         preferred_element_type=jnp.float32).astype(z_ref.dtype)
    xbc_ref[...] = jnp.dot(xn_mxu, wxbc_ref[...],
                           preferred_element_type=jnp.float32).astype(xbc_ref.dtype)
    # dt feeds softplus/exp chains downstream -> keep this tiny matmul in f32.
    dt_ref[...] = jnp.dot(xn, wdt_ref[...],
                          preferred_element_type=jnp.float32).astype(dt_ref.dtype)


def ln_in_proj(x, gamma, beta, mparams, *, eps=1e-5):
    Bt, L, d_model = x.shape
    d_inner, H, N = mparams['d_inner'], mparams['nheads'], mparams['d_state']
    conv_dim = d_inner + 2 * N
    m = Bt * L
    mp2 = _round_up(m, 8)
    x2 = _pad_rows(x.reshape(m, d_model), mp2)
    tm = _pick_row_tile(mp2)

    w_in = mparams['w_in']
    wz = w_in[:, :d_inner].astype(jnp.bfloat16)
    wxbc = w_in[:, d_inner:d_inner + conv_dim].astype(jnp.bfloat16)
    wdt = w_in[:, d_inner + conv_dim:]               # f32 on purpose

    z, xbc, dt = pl.pallas_call(
        functools.partial(_ln_inproj_kernel, eps=eps),
        out_shape=(jax.ShapeDtypeStruct((mp2, d_inner), x.dtype),
                   jax.ShapeDtypeStruct((mp2, conv_dim), x.dtype),
                   jax.ShapeDtypeStruct((mp2, H), jnp.float32)),
        grid_spec=pltpu.PrefetchScalarGridSpec(
            num_scalar_prefetch=0,
            grid=(pl.cdiv(mp2, tm),),
            in_specs=[
                pl.BlockSpec((tm, d_model), lambda i: (i, 0)),
                pl.BlockSpec((1, d_model), lambda i: (0, 0)),
                pl.BlockSpec((1, d_model), lambda i: (0, 0)),
                pl.BlockSpec((d_model, d_inner), lambda i: (0, 0)),
                pl.BlockSpec((d_model, conv_dim), lambda i: (0, 0)),
                pl.BlockSpec((d_model, H), lambda i: (0, 0)),
            ],
            out_specs=[
                pl.BlockSpec((tm, d_inner), lambda i: (i, 0)),
                pl.BlockSpec((tm, conv_dim), lambda i: (i, 0)),
                pl.BlockSpec((tm, H), lambda i: (i, 0)),
            ]),
        compiler_params=pltpu.CompilerParams(dimension_semantics=("parallel",)),
    )(x2, gamma.reshape(1, d_model), beta.reshape(1, d_model), wz, wxbc, wdt)

    if mp2 != m:
        z, xbc, dt = z[:m], xbc[:m], dt[:m]
    return (xbc.reshape(Bt, L, conv_dim),
            z.reshape(Bt, L, d_inner),
            dt.reshape(Bt, L, H))


# ----------------------------------------------------------------------------
# Kernel 2: conv1d + SiLU + chunked SSD (state carry) + gated RMSNorm + out_proj
# ----------------------------------------------------------------------------
def _conv_ssd_kernel(xbc_ref, z_ref, dt_ref, convw_ref, convb_ref,
                     alog_ref, dtb_ref, dskip_ref, rmsw_ref, wout_ref,
                     o_ref, state_ref, tail_ref,
                     *, nheads, headdim, d_state, d_conv, eps):
    H, P, N, K = nheads, headdim, d_state, d_conv
    d_inner = H * P
    c = pl.program_id(1)                              # chunk index (sequential)

    @pl.when(c == 0)
    def _():
        state_ref[...] = jnp.zeros_like(state_ref)    # SSM state S[n, h*P+p]
        tail_ref[...] = jnp.zeros_like(tail_ref)      # conv halo (K-1 rows)

    xbc_raw = xbc_ref[0].astype(jnp.float32)          # (Lc, conv_dim)
    Lc, conv_dim = xbc_raw.shape

    # ---- causal depthwise conv (K taps) + SiLU, halo carried across chunks ----
    xext = jnp.concatenate([tail_ref[...], xbc_raw], axis=0)     # (Lc+K-1, conv_dim)
    conv = jnp.zeros((Lc, conv_dim), jnp.float32)
    for k in range(K):                                # K=4, fully unrolled
        conv = conv + xext[k:k + Lc, :] * convw_ref[k:k + 1, :].astype(jnp.float32)
    conv = conv + convb_ref[...].astype(jnp.float32)
    xbc = conv * jax.nn.sigmoid(conv)                 # SiLU
    tail_ref[...] = xbc_raw[Lc - (K - 1):, :]         # raw tail for the next chunk

    x_flat = xbc[:, :d_inner]                         # (Lc, d_inner) channel = h*P+p
    Bmat = xbc[:, d_inner:d_inner + N]                # (Lc, N)
    Cmat = xbc[:, d_inner + N:d_inner + 2 * N]        # (Lc, N)

    # ---- dt = softplus(dt_raw + dt_bias) (stable), dtA, inclusive cumsum ----
    v = dt_ref[0].astype(jnp.float32) + dtb_ref[...].astype(jnp.float32)   # (Lc, H)
    dt = jnp.maximum(v, 0.0) + jnp.log(1.0 + jnp.exp(-jnp.abs(v)))
    A = -jnp.exp(alog_ref[...].astype(jnp.float32))   # (1, H)
    dtA = dt * A                                      # (Lc, H)

    row = lax.broadcasted_iota(jnp.int32, (Lc, Lc), 0)    # t
    col = lax.broadcasted_iota(jnp.int32, (Lc, Lc), 1)    # s
    tri_incl = (row >= col).astype(jnp.float32)           # s <= t
    cum = jnp.dot(tri_incl, dtA, preferred_element_type=jnp.float32)   # (Lc, H)

    # one-hot head->channel expansion E[h, h*P+p]=1 (lane-dense per-head broadcast)
    head = lax.broadcasted_iota(jnp.int32, (H, d_inner), 0)
    lane = lax.broadcasted_iota(jnp.int32, (H, d_inner), 1)
    E = ((lane >= head * P) & (lane < (head + 1) * P)).astype(jnp.float32)

    # ---- inter-chunk term from the carried state (lane-dense (Lc,N)@(N,d_inner)) --
    exp_cum = jnp.exp(cum)                                             # (Lc, H)
    exp_cum_e = jnp.dot(exp_cum, E, preferred_element_type=jnp.float32)
    y_inter = jnp.dot(Cmat, state_ref[...],
                      preferred_element_type=jnp.float32) * exp_cum_e  # (Lc, d_inner)

    # ---- state update: S_new = exp(cum_last)*S + B^T @ (x * w_last) ----
    cum_last = cum[Lc - 1:Lc, :]                                       # (1, H)
    w_last = jnp.exp(cum_last - cum) * dt                              # (Lc, H)
    w_last_e = jnp.dot(w_last, E, preferred_element_type=jnp.float32)
    decay_last_e = jnp.dot(jnp.exp(cum_last), E, preferred_element_type=jnp.float32)
    state_ref[...] = (state_ref[...] * decay_last_e +
                      jnp.dot(Bmat.T, x_flat * w_last_e,
                              preferred_element_type=jnp.float32))

    # ---- intra-chunk (quadratic, Lc bounded by chunking) ----
    cum_h = cum.T                                     # (H, Lc)
    dt_h = dt.T                                       # (H, Lc)
    diff = cum_h[:, :, None] - cum_h[:, None, :]      # (H, Lc, Lc)
    decay = jnp.exp(jnp.where((row >= col)[None], diff, -1e30))
    cb = jnp.dot(Cmat, Bmat.T, preferred_element_type=jnp.float32)     # C_t . B_s
    scores = decay * dt_h[:, None, :] * cb[None]      # (H, Lc, Lc)
    # TODO(synk): per-head (Lc,Lc)x(Lc,32) matmuls use only 32 MXU columns; a
    # block-diagonal packing would widen N, but at Lc<=128 this stays cheap.
    parts = [jnp.dot(scores[h], x_flat[:, h * P:(h + 1) * P],
                     preferred_element_type=jnp.float32) for h in range(H)]
    y = jnp.concatenate(parts, axis=1) + y_inter
    y = y + jnp.dot(dskip_ref[...].astype(jnp.float32), E,
                    preferred_element_type=jnp.float32) * x_flat       # + D*x

    # ---- gated RMSNorm: rmsnorm(y * silu(z)) * w, then fused out_proj ----
    zc = z_ref[0].astype(jnp.float32)
    y = y * (zc * jax.nn.sigmoid(zc))
    ms = jnp.mean(y * y, axis=-1, keepdims=True)
    y = y * lax.rsqrt(ms + eps) * rmsw_ref[...].astype(jnp.float32)
    # lane-dense (Lc, d_model=128) store
    o_ref[0] = jnp.dot(y.astype(wout_ref.dtype), wout_ref[...],
                       preferred_element_type=jnp.float32).astype(o_ref.dtype)


def conv_ssd_out_proj(xbc, z, dt, mparams, *, eps=1e-5):
    Bt2, L, conv_dim = xbc.shape
    d_inner, H = mparams['d_inner'], mparams['nheads']
    P, N, K = mparams['headdim'], mparams['d_state'], mparams['d_conv']
    d_model = mparams['w_out'].shape[1]
    chunk = _pick_ssd_chunk(L, K)
    n_chunks = L // chunk

    kern = functools.partial(_conv_ssd_kernel, nheads=H, headdim=P,
                             d_state=N, d_conv=K, eps=eps)
    return pl.pallas_call(
        kern,
        out_shape=jax.ShapeDtypeStruct((Bt2, L, d_model), xbc.dtype),
        grid_spec=pltpu.PrefetchScalarGridSpec(
            num_scalar_prefetch=0,
            grid=(Bt2, n_chunks),                     # chunks iterate sequentially
            in_specs=[
                pl.BlockSpec((1, chunk, conv_dim), lambda b, c: (b, c, 0)),
                pl.BlockSpec((1, chunk, d_inner), lambda b, c: (b, c, 0)),
                pl.BlockSpec((1, chunk, H), lambda b, c: (b, c, 0)),
                pl.BlockSpec((K, conv_dim), lambda b, c: (0, 0)),
                pl.BlockSpec((1, conv_dim), lambda b, c: (0, 0)),
                pl.BlockSpec((1, H), lambda b, c: (0, 0)),
                pl.BlockSpec((1, H), lambda b, c: (0, 0)),
                pl.BlockSpec((1, H), lambda b, c: (0, 0)),
                pl.BlockSpec((1, d_inner), lambda b, c: (0, 0)),
                pl.BlockSpec((d_inner, d_model), lambda b, c: (0, 0)),
            ],
            out_specs=pl.BlockSpec((1, chunk, d_model), lambda b, c: (b, c, 0)),
            scratch_shapes=[
                pltpu.VMEM((N, d_inner), jnp.float32),       # carried SSM state
                pltpu.VMEM((K - 1, conv_dim), jnp.float32),  # conv halo rows
            ]),
        compiler_params=pltpu.CompilerParams(
            dimension_semantics=("parallel", "arbitrary")),
    )(xbc, z, dt,
      mparams['conv_w'].T, mparams['conv_b'].reshape(1, conv_dim),
      mparams['A_log'].reshape(1, H), mparams['dt_bias'].reshape(1, H),
      mparams['D'].reshape(1, H), mparams['rms_w'].reshape(1, d_inner),
      mparams['w_out'].astype(jnp.bfloat16))


# ----------------------------------------------------------------------------
# Kernel 3: LayerNorm2 + FFN (Linear-GELU-Linear) + residual
# ----------------------------------------------------------------------------
def _ln_ffn_kernel(m_ref, res_ref, g_ref, b_ref, w1_ref, b1_ref, w2_ref, b2_ref,
                   o_ref, *, eps):
    x = m_ref[...].astype(jnp.float32)
    mu = jnp.mean(x, axis=-1, keepdims=True)
    xc = x - mu
    var = jnp.mean(xc * xc, axis=-1, keepdims=True)
    xn = xc * lax.rsqrt(var + eps)
    xn = xn * g_ref[...].astype(jnp.float32) + b_ref[...].astype(jnp.float32)
    h = jnp.dot(xn.astype(w1_ref.dtype), w1_ref[...],
                preferred_element_type=jnp.float32)
    h = h + b1_ref[...].astype(jnp.float32)
    # TODO(synk): nn.GELU() defaults to the exact erf form; tanh approximation is
    # used (difference ~1e-3) since erf has no guaranteed Mosaic lowering.
    h = jax.nn.gelu(h, approximate=True)
    y = jnp.dot(h.astype(w2_ref.dtype), w2_ref[...],
                preferred_element_type=jnp.float32)
    y = y + b2_ref[...].astype(jnp.float32) + res_ref[...].astype(jnp.float32)
    o_ref[...] = y.astype(o_ref.dtype)


def ln_ffn_residual(m_in, residual, gamma, beta, w1, b1, w2, b2, *, eps=1e-5):
    Bt, L, d_model = m_in.shape
    hidden = w1.shape[1]
    m = Bt * L
    mp2 = _round_up(m, 8)
    x2 = _pad_rows(m_in.reshape(m, d_model), mp2)
    r2 = _pad_rows(residual.reshape(m, d_model), mp2)
    tm = _pick_row_tile(mp2)

    # Raise the scoped-VMEM limit only above v5e's 16 MiB default; cap under
    # v7x's 64 MiB physical VMEM.
    vmem_need = (3 * tm * d_model * 4 * 2                      # x/res/out tiles, 2 bufs
                 + 2 * 2 * (d_model * hidden + hidden * d_model)  # bf16 weights, 2 bufs
                 + tm * hidden * 4)                            # f32 intermediate
    vmem_limit = None
    if vmem_need > 16 * 1024 * 1024:
        vmem_limit = min(int(vmem_need * 1.5), 48 * 1024 * 1024)

    cost = pl.CostEstimate(
        flops=4 * mp2 * d_model * hidden,
        transcendentals=mp2 * hidden,
        bytes_accessed=3 * mp2 * d_model * 4 + 2 * d_model * hidden * 2)

    out = pl.pallas_call(
        functools.partial(_ln_ffn_kernel, eps=eps),
        out_shape=jax.ShapeDtypeStruct((mp2, d_model), m_in.dtype),
        grid_spec=pltpu.PrefetchScalarGridSpec(
            num_scalar_prefetch=0,
            grid=(pl.cdiv(mp2, tm),),
            in_specs=[
                pl.BlockSpec((tm, d_model), lambda i: (i, 0)),
                pl.BlockSpec((tm, d_model), lambda i: (i, 0)),
                pl.BlockSpec((1, d_model), lambda i: (0, 0)),
                pl.BlockSpec((1, d_model), lambda i: (0, 0)),
                pl.BlockSpec((d_model, hidden), lambda i: (0, 0)),
                pl.BlockSpec((1, hidden), lambda i: (0, 0)),
                pl.BlockSpec((hidden, d_model), lambda i: (0, 0)),
                pl.BlockSpec((1, d_model), lambda i: (0, 0)),
            ],
            out_specs=pl.BlockSpec((tm, d_model), lambda i: (i, 0))),
        compiler_params=pltpu.CompilerParams(
            dimension_semantics=("parallel",),
            vmem_limit_bytes=vmem_limit),
        cost_estimate=cost,
    )(x2, r2, gamma.reshape(1, d_model), beta.reshape(1, d_model),
      w1.astype(jnp.bfloat16), b1.reshape(1, hidden),
      w2.astype(jnp.bfloat16), b2.reshape(1, d_model))
    return out[:m].reshape(Bt, L, d_model)


# ----------------------------------------------------------------------------
# Full BiMamba2Encoder forward
# ----------------------------------------------------------------------------
def bimamba2_encoder_forward(x, p):
    B = x.shape[0]
    mparams = p['mamba']
    # LayerNorm / in_proj / conv / SSD are per-sequence, so flip commutes with
    # them: process [x, flip(x)] in one doubled-batch pass through the shared
    # Mamba2 kernels (only the narrow d_model tensor is flipped in XLA).
    x_both = jnp.concatenate([x, jnp.flip(x, axis=1)], axis=0)
    xbc, z, dt = ln_in_proj(x_both, p['norm1_g'], p['norm1_b'], mparams)
    m_both = conv_ssd_out_proj(xbc, z, dt, mparams)
    mamba_out = m_both[:B] + jnp.flip(m_both[B:], axis=1)
    return ln_ffn_residual(mamba_out, x, p['norm2_g'], p['norm2_b'],
                           p['ffn_w1'], p['ffn_b1'], p['ffn_w2'], p['ffn_b2'])


# ----------------------------------------------------------------------------
# Pure-JAX reference (independent sequential-scan SSM formulation)
# ----------------------------------------------------------------------------
def _causal_depthwise_conv_silu(x, w, b):
    # x: (Bt, L, C), w: (C, K), b: (C,)  -- depthwise causal Conv1d + SiLU.
    Bt, L, C = x.shape
    K = w.shape[1]
    xpad = jnp.pad(x, ((0, 0), (K - 1, 0), (0, 0)))
    out = jnp.zeros_like(x)
    for k in range(K):
        out = out + xpad[:, k:k + L, :] * w[:, k]
    out = out + b
    return out * jax.nn.sigmoid(out)


def _ref_layer_norm(x, g, b, eps=1e-5):
    mu = jnp.mean(x, axis=-1, keepdims=True)
    var = jnp.mean((x - mu) ** 2, axis=-1, keepdims=True)
    return (x - mu) * lax.rsqrt(var + eps) * g + b


def _ref_mamba2(u, p):
    HI = lax.Precision.HIGHEST
    Bt, L, _ = u.shape
    d_inner, nheads, headdim, d_state = (p['d_inner'], p['nheads'],
                                         p['headdim'], p['d_state'])
    zxbcdt = jnp.einsum('bld,de->ble', u, p['w_in'], precision=HI)
    z = zxbcdt[..., :d_inner]
    xBC = zxbcdt[..., d_inner:2 * d_inner + 2 * d_state]
    dt = zxbcdt[..., -nheads:]
    xBC = _causal_depthwise_conv_silu(xBC, p['conv_w'], p['conv_b'])
    x = xBC[..., :d_inner]
    Bm = xBC[..., d_inner:d_inner + d_state]
    Cm = xBC[..., d_inner + d_state:]
    dt = jax.nn.softplus(dt + p['dt_bias'])
    A = -jnp.exp(p['A_log'])
    xh = x.reshape(Bt, L, nheads, headdim)

    def step(h, inp):
        x_t, b_t, c_t, dt_t = inp
        dA = jnp.exp(dt_t * A)
        h = (h * dA[..., None, None]
             + (dt_t[..., None] * x_t)[..., None] * b_t[:, None, None, :])
        y_t = jnp.einsum('bhpn,bn->bhp', h, c_t, precision=HI)
        return h, y_t

    h0 = jnp.zeros((Bt, nheads, headdim, d_state), jnp.float32)
    _, ys = lax.scan(step, h0, (xh.transpose(1, 0, 2, 3),
                                Bm.transpose(1, 0, 2),
                                Cm.transpose(1, 0, 2),
                                dt.transpose(1, 0, 2)))
    y = ys.transpose(1, 0, 2, 3) + p['D'][None, None, :, None] * xh
    y = y.reshape(Bt, L, d_inner)
    y = y * jax.nn.silu(z)
    y = y * lax.rsqrt(jnp.mean(y * y, axis=-1, keepdims=True) + 1e-5) * p['rms_w']
    return jnp.einsum('ble,ed->bld', y, p['w_out'], precision=HI)


def _ref_encoder(x, p):
    HI = lax.Precision.HIGHEST
    residual = x
    xn = _ref_layer_norm(x, p['norm1_g'], p['norm1_b'])
    fwd = _ref_mamba2(xn, p['mamba'])
    bwd = jnp.flip(_ref_mamba2(jnp.flip(xn, axis=1), p['mamba']), axis=1)
    m = _ref_layer_norm(fwd + bwd, p['norm2_g'], p['norm2_b'])
    h = jax.nn.gelu(jnp.einsum('bld,df->blf', m, p['ffn_w1'], precision=HI)
                    + p['ffn_b1'], approximate=True)
    return (jnp.einsum('blf,fd->bld', h, p['ffn_w2'], precision=HI)
            + p['ffn_b2'] + residual)


# ----------------------------------------------------------------------------
# Demo
# ----------------------------------------------------------------------------
if __name__ == "__main__":
    batch, seq = 2, 8
    d_model, n_state, headdim = 128, 16, 32       # d_model=128 -> lane-dense outputs
    expand, d_conv = 2, 4
    d_inner = expand * d_model                    # 256
    nheads = d_inner // headdim                   # 8
    conv_dim = d_inner + 2 * n_state              # 288
    d_in_proj = 2 * d_inner + 2 * n_state + nheads   # 552
    d_ff = 4 * d_model

    key = jax.random.PRNGKey(0)
    ks = jax.random.split(key, 16)

    def rnd(k, shape, scale):
        return jax.random.normal(k, shape, dtype=jnp.float32) * scale

    params = {
        'norm1_g': 1.0 + 0.1 * jax.random.normal(ks[0], (d_model,), jnp.float32),
        'norm1_b': 0.1 * jax.random.normal(ks[1], (d_model,), jnp.float32),
        'norm2_g': 1.0 + 0.1 * jax.random.normal(ks[2], (d_model,), jnp.float32),
        'norm2_b': 0.1 * jax.random.normal(ks[3], (d_model,), jnp.float32),
        'ffn_w1': rnd(ks[4], (d_model, d_ff), d_model ** -0.5),
        'ffn_b1': rnd(ks[5], (d_ff,), 0.01),
        'ffn_w2': rnd(ks[6], (d_ff, d_model), d_ff ** -0.5),
        'ffn_b2': rnd(ks[7], (d_model,), 0.01),
        'mamba': {
            'd_inner': d_inner, 'nheads': nheads, 'headdim': headdim,
            'd_state': n_state, 'd_conv': d_conv,
            'w_in': rnd(ks[8], (d_model, d_in_proj), d_model ** -0.5),
            'w_out': rnd(ks[9], (d_inner, d_model), d_inner ** -0.5),
            'conv_w': rnd(ks[10], (conv_dim, d_conv), 0.2),
            'conv_b': rnd(ks[11], (conv_dim,), 0.02),
            'A_log': jnp.log(jax.random.uniform(ks[12], (nheads,), jnp.float32,
                                                minval=1.0, maxval=4.0)),
            'dt_bias': 0.1 * jax.random.normal(ks[13], (nheads,), jnp.float32),
            'D': 1.0 + 0.1 * jax.random.normal(ks[14], (nheads,), jnp.float32),
            'rms_w': jnp.ones((d_inner,), jnp.float32),
        },
    }

    x = jax.random.normal(ks[15], (batch, seq, d_model), dtype=jnp.float32)

    out = bimamba2_encoder_forward(x, params)
    out = jax.block_until_ready(out)
    assert out.shape == (batch, seq, d_model)

    ref = _ref_encoder(x, params)
    max_err = float(jnp.max(jnp.abs(out - ref)))
    # bf16 MXU operands (f32 accumulation) in the projection kernels -> allow a
    # slightly looser tolerance than pure-f32; structural bugs would be O(1).
    assert jnp.allclose(out, ref, atol=5e-2, rtol=5e-2), (
        f"mismatch vs reference: max abs err {max_err}")

    print("KERNEL_OK")
</pallas_src>

<mosaic_0001>
module attributes {stable_mosaic.version = 11 : i64} {
  func.func @_ln_inproj_kernel(%arg0: i32, %arg1: memref<16x128xf32, #tpu.memory_space<vmem>>, %arg2: memref<1x128xf32, #tpu.memory_space<vmem>>, %arg3: memref<1x128xf32, #tpu.memory_space<vmem>>, %arg4: memref<128x256xbf16, #tpu.memory_space<vmem>>, %arg5: memref<128x288xbf16, #tpu.memory_space<vmem>>, %arg6: memref<128x8xf32, #tpu.memory_space<vmem>>, %arg7: memref<16x256xf32, #tpu.memory_space<vmem>>, %arg8: memref<16x288xf32, #tpu.memory_space<vmem>>, %arg9: memref<16x8xf32, #tpu.memory_space<vmem>>) attributes {dimension_semantics = [#tpu.dimension_semantics<parallel>], iteration_bounds = array<i64: 2>, scalar_prefetch = 0 : i64, scratch_operands = 0 : i64, tpu.core_type = #tpu.core_type<tc>, window_params = [{transform_indices = @transform_0, window_bounds = array<i64: 16, 128>}, {pipeline_mode = #tpu.pipeline_mode<synchronous>, transform_indices = @transform_1, window_bounds = array<i64: 1, 128>}, {pipeline_mode = #tpu.pipeline_mode<synchronous>, transform_indices = @transform_2, window_bounds = array<i64: 1, 128>}, {pipeline_mode = #tpu.pipeline_mode<synchronous>, transform_indices = @transform_3, window_bounds = array<i64: 128, 256>}, {pipeline_mode = #tpu.pipeline_mode<synchronous>, transform_indices = @transform_4, window_bounds = array<i64: 128, 288>}, {pipeline_mode = #tpu.pipeline_mode<synchronous>, transform_indices = @transform_5, window_bounds = array<i64: 128, 8>}, {transform_indices = @transform_6, window_bounds = array<i64: 16, 256>}, {transform_indices = @transform_7, window_bounds = array<i64: 16, 288>}, {transform_indices = @transform_8, window_bounds = array<i64: 16, 8>}]} {
    %c0 = arith.constant 0 : index
    %c0_0 = arith.constant 0 : index
    %0 = vector.load %arg1[%c0, %c0_0] : memref<16x128xf32, #tpu.memory_space<vmem>>, vector<16x128xf32>
    %cst = arith.constant dense<0.000000e+00> : vector<16xf32>
    %1 = vector.multi_reduction <add>, %0, %cst [1] : vector<16x128xf32> to vector<16xf32>
    %2 = vector.shape_cast %1 : vector<16xf32> to vector<16x1xf32>
    %cst_1 = arith.constant 1.280000e+02 : f32
    %3 = vector.broadcast %cst_1 : f32 to vector<16x1xf32>
    %4 = arith.divf %2, %3 : vector<16x1xf32>
    %5 = vector.broadcast %4 : vector<16x1xf32> to vector<16x128xf32>
    %6 = arith.subf %0, %5 : vector<16x128xf32>
    %7 = arith.mulf %6, %6 : vector<16x128xf32>
    %cst_2 = arith.constant dense<0.000000e+00> : vector<16xf32>
    %8 = vector.multi_reduction <add>, %7, %cst_2 [1] : vector<16x128xf32> to vector<16xf32>
    %9 = vector.shape_cast %8 : vector<16xf32> to vector<16x1xf32>
    %cst_3 = arith.constant 1.280000e+02 : f32
    %10 = vector.broadcast %cst_3 : f32 to vector<16x1xf32>
    %11 = arith.divf %9, %10 : vector<16x1xf32>
    %cst_4 = arith.constant 9.99999974E-6 : f32
    %12 = vector.broadcast %cst_4 : f32 to vector<16x1xf32>
    %13 = arith.addf %11, %12 : vector<16x1xf32>
    %14 = math.rsqrt %13 : vector<16x1xf32>
    %15 = vector.broadcast %14 : vector<16x1xf32> to vector<16x128xf32>
    %16 = arith.mulf %6, %15 : vector<16x128xf32>
    %c0_5 = arith.constant 0 : index
    %c0_6 = arith.constant 0 : index
    %17 = vector.load %arg2[%c0_5, %c0_6] : memref<1x128xf32, #tpu.memory_space<vmem>>, vector<1x128xf32>
    %18 = vector.broadcast %17 : vector<1x128xf32> to vector<16x128xf32>
    %19 = arith.mulf %16, %18 : vector<16x128xf32>
    %c0_7 = arith.constant 0 : index
    %c0_8 = arith.constant 0 : index
    %20 = vector.load %arg3[%c0_7, %c0_8] : memref<1x128xf32, #tpu.memory_space<vmem>>, vector<1x128xf32>
    %21 = vector.broadcast %20 : vector<1x128xf32> to vector<16x128xf32>
    %22 = arith.addf %19, %21 : vector<16x128xf32>
    %23 = arith.truncf %22 : vector<16x128xf32> to vector<16x128xbf16>
    %c0_9 = arith.constant 0 : index
    %c0_10 = arith.constant 0 : index
    %24 = vector.load %arg4[%c0_9, %c0_10] : memref<128x256xbf16, #tpu.memory_space<vmem>>, vector<128x256xbf16>
    %cst_11 = arith.constant dense<0.000000e+00> : vector<16x256xf32>
    %25 = tpu.matmul %23, %24, %cst_11 {dimension_numbers = #tpu.dot_dimension_numbers<[1], [0], [0], [1], [0, 0, 1, 1], [], []>} : vector<16x128xbf16>, vector<128x256xbf16>, vector<16x256xf32> -> vector<16x256xf32>
    %c0_12 = arith.constant 0 : index
    %c0_13 = arith.constant 0 : index
    %26 = vector.load %arg7[%c0_12, %c0_13] : memref<16x256xf32, #tpu.memory_space<vmem>>, vector<16x256xf32>
    tpu.vector_store %arg7[%c0_12, %c0_13], %25 {strides = array<i32>} : memref<16x256xf32, #tpu.memory_space<vmem>>, vector<16x256xf32>,
    %c0_14 = arith.constant 0 : index
    %c0_15 = arith.constant 0 : index
    %27 = vector.load %arg5[%c0_14, %c0_15] : memref<128x288xbf16, #tpu.memory_space<vmem>>, vector<128x288xbf16>
    %cst_16 = arith.constant dense<0.000000e+00> : vector<16x288xf32>
    %28 = tpu.matmul %23, %27, %cst_16 {dimension_numbers = #tpu.dot_dimension_numbers<[1], [0], [0], [1], [0, 0, 1, 1], [], []>} : vector<16x128xbf16>, vector<128x288xbf16>, vector<16x288xf32> -> vector<16x288xf32>
    %c0_17 = arith.constant 0 : index
    %c0_18 = arith.constant 0 : index
    %29 = vector.load %arg8[%c0_17, %c0_18] : memref<16x288xf32, #tpu.memory_space<vmem>>, vector<16x288xf32>
    tpu.vector_store %arg8[%c0_17, %c0_18], %28 {strides = array<i32>} : memref<16x288xf32, #tpu.memory_space<vmem>>, vector<16x288xf32>,
    %c0_19 = arith.constant 0 : index
    %c0_20 = arith.constant 0 : index
    %30 = vector.load %arg6[%c0_19, %c0_20] : memref<128x8xf32, #tpu.memory_space<vmem>>, vector<128x8xf32>
    %cst_21 = arith.constant dense<0.000000e+00> : vector<16x8xf32>
    %31 = tpu.matmul %22, %30, %cst_21 {dimension_numbers = #tpu.dot_dimension_numbers<[1], [0], [0], [1], [0, 0, 1, 1], [], []>} : vector<16x128xf32>, vector<128x8xf32>, vector<16x8xf32> -> vector<16x8xf32>
    %c0_22 = arith.constant 0 : index
    %c0_23 = arith.constant 0 : index
    %32 = vector.load %arg9[%c0_22, %c0_23] : memref<16x8xf32, #tpu.memory_space<vmem>>, vector<16x8xf32>
    tpu.vector_store %arg9[%c0_22, %c0_23], %31 {strides = array<i32>} : memref<16x8xf32, #tpu.memory_space<vmem>>, vector<16x8xf32>,
    return
  }
  func.func @transform_0(%arg0: i32) -> (i32, i32) {
    %c0_i32 = arith.constant 0 : i32
    %c0_i32_0 = arith.constant 0 : i32
    return %arg0, %c0_i32 : i32, i32
  }
  func.func @transform_1(%arg0: i32) -> (i32, i32) {
    %c0_i32 = arith.constant 0 : i32
    %c0_i32_0 = arith.constant 0 : i32
    %c0_i32_1 = arith.constant 0 : i32
    return %c0_i32, %c0_i32_0 : i32, i32
  }
  func.func @transform_2(%arg0: i32) -> (i32, i32) {
    %c0_i32 = arith.constant 0 : i32
    %c0_i32_0 = arith.constant 0 : i32
    %c0_i32_1 = arith.constant 0 : i32
    return %c0_i32, %c0_i32_0 : i32, i32
  }
  func.func @transform_3(%arg0: i32) -> (i32, i32) {
    %c0_i32 = arith.constant 0 : i32
    %c0_i32_0 = arith.constant 0 : i32
    %c0_i32_1 = arith.constant 0 : i32
    return %c0_i32, %c0_i32_0 : i32, i32
  }
  func.func @transform_4(%arg0: i32) -> (i32, i32) {
    %c0_i32 = arith.constant 0 : i32
    %c0_i32_0 = arith.constant 0 : i32
    %c0_i32_1 = arith.constant 0 : i32
    return %c0_i32, %c0_i32_0 : i32, i32
  }
  func.func @transform_5(%arg0: i32) -> (i32, i32) {
    %c0_i32 = arith.constant 0 : i32
    %c0_i32_0 = arith.constant 0 : i32
    %c0_i32_1 = arith.constant 0 : i32
    return %c0_i32, %c0_i32_0 : i32, i32
  }
  func.func @transform_6(%arg0: i32) -> (i32, i32) {
    %c0_i32 = arith.constant 0 : i32
    %c0_i32_0 = arith.constant 0 : i32
    return %arg0, %c0_i32 : i32, i32
  }
  func.func @transform_7(%arg0: i32) -> (i32, i32) {
    %c0_i32 = arith.constant 0 : i32
    %c0_i32_0 = arith.constant 0 : i32
    return %arg0, %c0_i32 : i32, i32
  }
  func.func @transform_8(%arg0: i32) -> (i32, i32) {
    %c0_i32 = arith.constant 0 : i32
    %c0_i32_0 = arith.constant 0 : i32
    return %arg0, %c0_i32 : i32, i32
  }
}

</mosaic_0001>

<bundles_post_ra>
// kernel: tpu_custom_call.1
= control target key start
LH: loop header
LB: loop body
LE: loop exit
PB: predicated region body
PF: predicated region fallthrough
CT: control target
= control target key end

     0   :  { %s1790_s0 = inlined_call_operand.vmem [shape: f32[32,128], index: 0, kind: input, shape index: {}]   ;;  %s1791_s1 = inlined_call_operand.vmem [shape: f32[1,128], index: 1, kind: input, shape index: {}]   ;;  %s1792_s2 = inlined_call_operand.vmem [shape: f32[1,128], index: 2, kind: input, shape index: {}]   ;;  %s1793_s3 = inlined_call_operand.vmem [shape: bf16[128,256], index: 3, kind: input, shape index: {}]   ;;  %s1794_s4 = inlined_call_operand.vmem [shape: bf16[128,288], index: 4, kind: input, shape index: {}]   ;;  %s1795_s5 = inlined_call_operand.vmem [shape: f32[128,8], index: 5, kind: input, shape index: {}]   ;;  %s1796_s6 = inlined_call_operand.hbm [shape: f32[32,256], index: 6, kind: output, shape index: {0}]   ;;  %s1797_s7 = inlined_call_operand.hbm [shape: f32[32,288], index: 7, kind: output, shape index: {1}]   ;;  %s1798_s8 = inlined_call_operand.vmem [shape: f32[32,8], index: 8, kind: output, shape index: {2}]  }
   0x1   :  { %1800 = sst [smem:[#allocation8_spill]] %s1790_s0 }
   0x2   :  { %14 = vsyncpa [#allocation3], 0 }
   0x3   :  { %16 = vsyncpa [#allocation3 + $0x1], 0 }
   0x4   :  { %17 = vsyncpa [#allocation5], 0 }
   0x5   :  { %19 = vsyncpa [#allocation5 + $0x1], 0  ;;  %s1433_s27 = smov 0   ;;  %s1435_s28 = smov 0  }
   0x6   :  { %s1437_s29 = smov 0   ;;  %s1439_s30 = smov 0  }
   0x7 LB: > { %s1454_s9 = sadd.s32 4294967295, %s1377_s30   ;;  %s1030_s10 = sadd.s32 4294967294, %s1377_s30   ;;  %s1377_s30 = sphi %s1439_s30, %s1809_s30   ;;  %s1373_s29 = sphi %s1437_s29, %s1808_s29   ;;  %s1369_s28 = sphi %s1435_s28, %s1807_s28   ;;  %s1365_s27 = sphi %s1433_s27, %s1806_s27  }
   0x8   : > { %s1458_s11 = sadd.s32 1, %s1377_s30   ;;  %s163_s12 = sadd.s32 1, %s1373_s29 }
   0x9   : > { %s160_s13 = ssub.s32 %s1377_s30, %s1458_s11  ;;  %p173_p0 = scmp.ne.s32.totalorder %s1373_s29, %s1369_s28 }
   0xa   : > { %p161_p1 = scmp.eq.s32.totalorder %s160_s13, 0  ;;  %p174_p2 = scmp.eq.s32.totalorder %s1454_s9, 1 }
   0xb   : > { %p179_p3 = scmp.ne.s32.totalorder %s1369_s28, %s1365_s27  ;;  %p180_p4 = scmp.eq.s32.totalorder %s1030_s10, 1 }
   0xc   : > { %s1469_s14 = scalar_select %p161_p1, %s1373_s29, %s163_s12  }
   0xd   : > { %p1471_p5 = por %p174_p2, %p173_p0  ;;  %p1475_p6 = por %p180_p4, %p179_p3 }
   0xe   : > { %p1033_p7 = scmp.ge.s32.totalorder %s1377_s30, 1  ;;  %p274_p8 = scmp.lt.s32.totalorder %s1377_s30, 3 }
  0x10   : > { %p275_p9 = pnand %p1033_p7, %p274_p8 }
  0x11   : > { %s1035_s17 = sshll.u32 (!%p275_p9), %s1454_s9, 1  ;;  %s1803_s0 = sld [smem:[#allocation8_spill]] (!%p275_p9) }
  0x12   : > { %278 = sbr.rel (%p275_p9) target bundleno = 583 (0x247), region = 44  ;;  %p319_p10 = scmp.lt.s32.totalorder (!%p275_p9), %s1035_s17, 3 }
  0x13   : > { %s1693_s12 = sand.u32 (!%p275_p9), 1, %s1369_s28   ;;  %s1091_s23 = sshll.u32 (!%p275_p9), %s1454_s9, 9 }
  0x14   : > { %s1174_s13 = smul.u32 (!%p275_p9), 48, %s1693_s12  ;;  %s1034_s19 = sshll.u32 (!%p275_p9), %s1693_s12, 5 }
  0x15   : > { %s303_s20 = scalar_lea.vmem (!%p275_p9), [#allocation2], %s1034_s19  ;;  %s1707_s26 = scalar_lea.hbm (!%p275_p9), %s1796_s6, %s1091_s23 }
  0x16   : > { %s1697_s22 = scalar_lea.vmem (!%p275_p9), [#allocation4], %s1174_s13  ;;  %s1382_s19 = smov (!%p275_p9), [#allocation2]  }
  0x17   : > { %s1811_s17 = smov (!%p319_p10, %s1035_s17), 3  ;;  %v1227_v2 = vld [vmem:[%s1793_s3 + $0x74] ss:$8 sps:$4 sm:$0xff]   ;;  %v1229_v3 = vld [vmem:[%s1794_s4 + $0xac] ss:$12 sps:$4 sm:$0xff]   ;;  %v1379_v36 = vmov 0  }
  0x18   : > { %s1799_s18 = sshll.u32 %s1811_s17, 3  ;;  %v1231_v4 = vld [vmem:[%s1793_s3 + $0x70] ss:$8 sps:$4 sm:$0xff]   ;;  %v1232_v5 = vld [vmem:[%s1794_s4 + $0xa8] ss:$12 sps:$4 sm:$0xff]   ;;  %473 = vmatprep.subr.bf16.mxu0 %v1227_v2  ;;  %680 = vmatprep.subr.bf16.mxu1 %v1229_v3  ;;  %v1380_v44 = vmov 0.0  }
  0x19   : > { %s322_s21 = scalar_lea.vmem %s1803_s0, %s1799_s18  ;;  %474 = vmatpush1.bf16.msra.mxu0 %v1231_v4  ;;  %681 = vmatpush1.bf16.msra.mxu1 %v1232_v5  ;;  %v1233_v14 = vld [vmem:[%s1793_s3 + $0x64] ss:$8 sps:$4 sm:$0xff]   ;;  %v1235_v15 = vld [vmem:[%s1794_s4 + $0x94] ss:$12 sps:$4 sm:$0xff]   ;;  %v1238_v17 = vld [vmem:[%s1794_s4 + $0x90] ss:$12 sps:$4 sm:$0xff]  }
  0x1a   : > { %v333_v0 = vld [vmem:[%s322_s21] sm:$0xff]  ;;  %v334_v1 = vld [vmem:[%s322_s21 + $0x8] sm:$0xff]  ;;  %475 = vmatprep.subr.bf16.mxu0 %v1233_v14  ;;  %682 = vmatprep.subr.bf16.mxu1 %v1235_v15  ;;  %v1239_v18 = vld [vmem:[%s1793_s3 + $0x54] ss:$8 sps:$4 sm:$0xff]   ;;  %vm1381_vm0 = vmmov 0   ;;  %s890_s21 = sshll.u32 %s303_s20, 4  ;;  %s1702_s21 = int_to_ptr.vmem [resolvable:$true] %s890_s21 }
  0x1b   : > { %335 = vadd.xlane.f32.xlu0 %v333_v0  ;;  %v1237_v16 = vld [vmem:[%s1793_s3 + $0x60] ss:$8 sps:$4 sm:$0xff]   ;;  %v1243_v20 = vld [vmem:[%s1793_s3 + $0x50] ss:$8 sps:$4 sm:$0xff]   ;;  %v1245_v22 = vld [vmem:[%s1793_s3 + $0x44] ss:$8 sps:$4 sm:$0xff]   ;;  %505 = vmatprep.mubr.bf16.mxu0 %v1379_v36 }
  0x1c   : > { %v1241_v19 = vld [vmem:[%s1794_s4 + $0x7c] ss:$12 sps:$4 sm:$0xff]   ;;  %v1244_v21 = vld [vmem:[%s1794_s4 + $0x78] ss:$12 sps:$4 sm:$0xff]   ;;  %v1250_v25 = vld [vmem:[%s1794_s4 + $0x60] ss:$12 sps:$4 sm:$0xff]   ;;  %712 = vmatprep.mubr.bf16.mxu1 %v1379_v36 }
  0x1d   : > { %476 = vmatpush1.bf16.msra.mxu0 %v1237_v16  ;;  %683 = vmatpush1.bf16.msra.mxu1 %v1238_v17  ;;  %v1247_v23 = vld [vmem:[%s1794_s4 + $0x64] ss:$12 sps:$4 sm:$0xff]   ;;  %v1249_v24 = vld [vmem:[%s1793_s3 + $0x40] ss:$8 sps:$4 sm:$0xff]   ;;  %v1251_v26 = vld [vmem:[%s1793_s3 + $0x34] ss:$8 sps:$4 sm:$0xff]  }
  0x1e   : > { %477 = vmatprep.subr.bf16.mxu0 %v1239_v18  ;;  %684 = vmatprep.subr.bf16.mxu1 %v1241_v19  ;;  %v1253_v27 = vld [vmem:[%s1794_s4 + $0x4c] ss:$12 sps:$4 sm:$0xff]   ;;  %v1256_v29 = vld [vmem:[%s1794_s4 + $0x48] ss:$12 sps:$4 sm:$0xff]   ;;  %v1262_v33 = vld [vmem:[%s1794_s4 + $0x30] ss:$12 sps:$4 sm:$0xff]  }
  0x1f   : > { %337 = vadd.xlane.f32.xlu0 %v334_v1  ;;  %v1255_v28 = vld [vmem:[%s1793_s3 + $0x30] ss:$8 sps:$4 sm:$0xff]   ;;  %v1257_v30 = vld [vmem:[%s1793_s3 + $0x24] ss:$8 sps:$4 sm:$0xff]   ;;  %v1259_v31 = vld [vmem:[%s1794_s4 + $0x34] ss:$12 sps:$4 sm:$0xff]  }
  0x20   : > { %v1261_v32 = vld [vmem:[%s1793_s3 + $0x20] ss:$8 sps:$4 sm:$0xff]   ;;  %v1263_v34 = vld [vmem:[%s1793_s3 + $0x14] ss:$8 sps:$4 sm:$0xff]   ;;  %v1267_v37 = vld [vmem:[%s1793_s3 + $0x10] ss:$8 sps:$4 sm:$0xff]  }
  0x21   : > { %478 = vmatpush1.bf16.msra.mxu0 %v1243_v20  ;;  %685 = vmatpush1.bf16.msra.mxu1 %v1244_v21  ;;  %v1265_v35 = vld [vmem:[%s1794_s4 + $0x1c] ss:$12 sps:$4 sm:$0xff]   ;;  %v1268_v38 = vld [vmem:[%s1794_s4 + $0x18] ss:$12 sps:$4 sm:$0xff]   ;;  %v1274_v42 = vld [vmem:[%s1794_s4] ss:$12 sps:$4 sm:$0xff]  }
  0x22   : > { %479 = vmatprep.subr.bf16.mxu0 %v1245_v22  ;;  %686 = vmatprep.subr.bf16.mxu1 %v1247_v23  ;;  %v1269_v39 = vld [vmem:[%s1793_s3 + $0x4] ss:$8 sps:$4 sm:$0xff]   ;;  %v1273_v41 = vld [vmem:[%s1793_s3] ss:$8 sps:$4 sm:$0xff]   ;;  %v786_v43 = vld [vmem:[%s1795_s5 + $0x78] sm:$0xff]  ;;  %s1287_s13 = scalar_lea.vmem %s1702_s21, 512 }
  0x23   : > { %v1271_v40 = vld [vmem:[%s1794_s4 + $0x4] ss:$12 sps:$4 sm:$0xff]   ;;  %v1039_v53 = vld [vmem:[%s1791_s1] ss:$0 sm:$0xff]  ;;  %v782_v3 = vld [vmem:[%s1795_s5 + $0x58] sm:$0xff]  ;;  %p1288_p11 = scmp.ne.s32.totalorder %s1702_s21, %s1287_s13  ;;  %s1291_s18 = sshll.u32 %s1382_s19, 4  ;;  %s1292_s18 = int_to_ptr.vmem [resolvable:$false] %s1291_s18 }
  0x24   : > { %v1040_v57 = vld [vmem:[%s1792_s2] ss:$0 sm:$0xff]  ;;  %v1275_v61 = vld [vmem:[%s1794_s4 + $0xb0] ss:$12 sps:$4 sm:$0xff]   ;;  %v772_v18 = vld [vmem:[%s1795_s5 + $0x8] sm:$0xff]  ;;  %s1293_s0 = scalar_lea.vmem %s1292_s18, 1024  ;;  %p1294_p0 = scmp.lt.s32.totalorder %s1702_s21, %s1292_s18 }
  0x25   : > { %480 = vmatpush1.bf16.msra.mxu0 %v1249_v24  ;;  %687 = vmatpush1.bf16.msra.mxu1 %v1250_v25  ;;  %v785_v63 = vld [vmem:[%s1795_s5 + $0x70] sm:$0xff]  ;;  %v783_v2 = vld [vmem:[%s1795_s5 + $0x60] sm:$0xff]  ;;  %v774_v15 = vld [vmem:[%s1795_s5 + $0x18] sm:$0xff]  ;;  %p1289_p12 = pnand %p1288_p11, %p1471_p5  ;;  %p1295_p1 = scmp.lt.s32.totalorder %s1293_s0, %s1287_s13 }
  0x26   : > { %481 = vmatprep.subr.bf16.mxu0 %v1251_v26  ;;  %688 = vmatprep.subr.bf16.mxu1 %v1253_v27  ;;  %v1277_v4 = vld [vmem:[%s1794_s4 + $0x80] ss:$12 sps:$4 sm:$0xff]   ;;  %v781_v5 = vld [vmem:[%s1795_s5 + $0x50] sm:$0xff] }
  0x27   : > { %v775_v14 = vld [vmem:[%s1795_s5 + $0x20] sm:$0xff]  ;;  %v773_v17 = vld [vmem:[%s1795_s5 + $0x10] sm:$0xff]  ;;  %p1290_p13 = pneg %p1289_p12  ;;  %p1296_p2 = por %p1295_p1, %p1294_p0 }
  0x28   : > { %v1281_v16 = vld [vmem:[%s1794_s4 + $0x20] ss:$12 sps:$4 sm:$0xff]   ;;  %v1282_v19 = vld [vmem:[%s1794_s4 + $0x8] ss:$12 sps:$4 sm:$0xff]  }
  0x29   : > { %482 = vmatpush1.bf16.msra.mxu0 %v1255_v28  ;;  %689 = vmatpush1.bf16.msra.mxu1 %v1256_v29  ;;  %v771_v20 = vld [vmem:[%s1795_s5] sm:$0xff]  ;;  %p1297_p3 = pnand %p1296_p2, %p1290_p13 }
  0x2a   : > { %483 = vmatprep.subr.bf16.mxu0 %v1257_v30  ;;  %690 = vmatprep.subr.bf16.mxu1 %v1259_v31 }
  0x2d   : > { %484 = vmatpush1.bf16.msra.mxu0 %v1261_v32  ;;  %691 = vmatpush1.bf16.msra.mxu1 %v1262_v33 }
  0x2e   : > { %485 = vmatprep.subr.bf16.mxu0 %v1263_v34  ;;  %692 = vmatprep.subr.bf16.mxu1 %v1265_v35 }
  0x31   : > { %486 = vmatpush1.bf16.msra.mxu0 %v1267_v37  ;;  %693 = vmatpush1.bf16.msra.mxu1 %v1268_v38 }
  0x32   : > { %487 = vmatprep.subr.bf16.mxu0 %v1269_v39  ;;  %694 = vmatprep.subr.bf16.mxu1 %v1271_v40 }
  0x35   : > { %488 = vmatpush1.bf16.msra.mxu0 %v1273_v41  ;;  %695 = vmatpush1.bf16.msra.mxu1 %v1274_v42 }
  0x36   : > { %1119 = vmatprep.subr.bf16.mxu0 %v1380_v44  ;;  %1139 = vmatprep.subr.mxu1 %v786_v43 }
  0xa4   : > { %v336_v6 = vpop.xlane.xlu0 %335 }
  0xa5   : > { %v340_v7 = vmul.f32 0.0078125, %v336_v6  ;;  %v780_v6 = vld [vmem:[%s1795_s5 + $0x48] sm:$0xff] }
  0xa7   : > { %v1502_v8 = vsub.f32 %v333_v0, %v340_v7  ;;  %v784_v0 = vld [vmem:[%s1795_s5 + $0x68] sm:$0xff] }
  0xa8   : > { %v338_v9 = vpop.xlane.xlu0 %337  ;;  %v1278_v7 = vld [vmem:[%s1794_s4 + $0x68] ss:$12 sps:$4 sm:$0xff]  }
  0xa9   : > { %v341_v10 = vmul.f32 0.0078125, %v338_v9  ;;  %v344_v11 = vmul.f32 %v1502_v8, %v1502_v8  ;;  %v778_v9 = vld [vmem:[%s1795_s5 + $0x38] sm:$0xff] }
  0xab   : > { %v1506_v12 = vsub.f32 %v334_v1, %v341_v10  ;;  %346 = vadd.xlane.f32.xlu1 %v344_v11  ;;  %v1276_v1 = vld [vmem:[%s1794_s4 + $0x98] ss:$12 sps:$4 sm:$0xff]   ;;  %v1279_v10 = vld [vmem:[%s1794_s4 + $0x50] ss:$12 sps:$4 sm:$0xff]  }
  0xac   : > { %v777_v11 = vld [vmem:[%s1795_s5 + $0x30] sm:$0xff] }
  0xad   : > { %v345_v13 = vmul.f32 %v1506_v12, %v1506_v12 }
  0xaf   : > { %348 = vadd.xlane.f32.xlu1 %v345_v13  ;;  %v1280_v13 = vld [vmem:[%s1794_s4 + $0x38] ss:$12 sps:$4 sm:$0xff]  }
 0x134   : > { %v347_v45 = vpop.xlane.xlu1 %346 }
 0x135   : > { %v350_v46 = vmul.f32 0.0078125, %v347_v45 }
 0x137   : > { %v352_v47 = vadd.f32 1e-05, %v350_v46 }
 0x138   : > { %v349_v48 = vpop.xlane.xlu1 %348 }
 0x139   : > { %1283 = vrsqrt.f32 %v352_v47  ;;  %v351_v49 = vmul.f32 0.0078125, %v349_v48 }
 0x13b   : > { %v353_v50 = vadd.f32 1e-05, %v351_v49 }
 0x13d   : > { %1285 = vrsqrt.f32 %v353_v50 }
 0x146   : > { %v1284_v51 = vpop.eup %1283 }
 0x147   : > { %v356_v52 = vmul.f32 %v1284_v51, %v1502_v8  ;;  %v779_v8 = vld [vmem:[%s1795_s5 + $0x40] sm:$0xff] }
 0x149   : > { %v365_v56 = vmul.f32 %v1039_v53, %v356_v52 }
 0x14a   : > { %v1286_v54 = vpop.eup %1285 }
 0x14b   : > { %v357_v55 = vmul.f32 %v1286_v54, %v1506_v12  ;;  %v374_v59 = vadd.f32 %v1040_v57, %v365_v56  ;;  %v776_v12 = vld [vmem:[%s1795_s5 + $0x28] sm:$0xff] }
 0x14d   : > { %v366_v58 = vmul.f32 %v1039_v53, %v357_v55 }
 0x14f   : > { %v1606_v60 = vadd.f32 %v1040_v57, %v366_v58 }
 0x151   : > { %v1612_v62 = vpack.c.bf16 %v1606_v60, %v374_v59 }
 0x153   : > { %506 = vmatmul.mubr.bf16.vlgmr.msra.gmra.mxu0 %v1612_v62  ;;  %713 = vmatmul.mubr.bf16.vlgmr.msra.gmra.mxu1 %v1612_v62 }
 0x154   : > { %1120 = vmatpush3.bf16.msra.mxu0 %v1275_v61  ;;  %1140 = vmatpush3.msra.mxu1 %v786_v43 }
 0x155   : > { %1141 = vmatprep.subr.mxu1 %v785_v63  ;;  %1171 = vmatprep.mubr.f32.mxu1 %v374_v59 }
 0x156   : > { %1142 = vmatpush3.msra.mxu1 %v785_v63  ;;  %1121 = vmatprep.subr.bf16.mxu0 %v1380_v44 }
 0x157   : > { %1143 = vmatprep.subr.mxu1 %v784_v0  ;;  %1135 = vmatprep.mubr.msk.bf16.mxu0 %vm1381_vm0, %v1380_v44 }
 0x158   : > { %1122 = vmatpush3.bf16.msra.mxu0 %v1276_v1  ;;  %1144 = vmatpush3.msra.mxu1 %v784_v0 }
 0x159   : > { %1145 = vmatprep.subr.mxu1 %v783_v2  ;;  %1123 = vmatprep.subr.bf16.mxu0 %v1380_v44 }
 0x15a   : > { %1146 = vmatpush3.msra.mxu1 %v783_v2 }
 0x15b   : > { %1147 = vmatprep.subr.mxu1 %v782_v3 }
 0x15c   : > { %1124 = vmatpush3.bf16.msra.mxu0 %v1277_v4  ;;  %1148 = vmatpush3.msra.mxu1 %v782_v3 }
 0x15d   : > { %1149 = vmatprep.subr.mxu1 %v781_v5  ;;  %1125 = vmatprep.subr.bf16.mxu0 %v1380_v44 }
 0x15e   : > { %1150 = vmatpush3.msra.mxu1 %v781_v5 }
 0x15f   : > { %1151 = vmatprep.subr.mxu1 %v780_v6 }
 0x160   : > { %1126 = vmatpush3.bf16.msra.mxu0 %v1278_v7  ;;  %1152 = vmatpush3.msra.mxu1 %v780_v6 }
 0x161   : > { %1153 = vmatprep.subr.mxu1 %v779_v8  ;;  %1127 = vmatprep.subr.bf16.mxu0 %v1380_v44 }
 0x162   : > { %1154 = vmatpush3.msra.mxu1 %v779_v8 }
 0x163   : > { %1155 = vmatprep.subr.mxu1 %v778_v9 }
 0x164   : > { %1128 = vmatpush3.bf16.msra.mxu0 %v1279_v10  ;;  %1156 = vmatpush3.msra.mxu1 %v778_v9 }
 0x165   : > { %1157 = vmatprep.subr.mxu1 %v777_v11  ;;  %1129 = vmatprep.subr.bf16.mxu0 %v1380_v44 }
 0x166   : > { %1158 = vmatpush3.msra.mxu1 %v777_v11 }
 0x167   : > { %1159 = vmatprep.subr.mxu1 %v776_v12 }
 0x168   : > { %1130 = vmatpush3.bf16.msra.mxu0 %v1280_v13  ;;  %1160 = vmatpush3.msra.mxu1 %v776_v12 }
 0x169   : > { %1161 = vmatprep.subr.mxu1 %v775_v14  ;;  %1131 = vmatprep.subr.bf16.mxu0 %v1380_v44 }
 0x16a   : > { %1162 = vmatpush3.msra.mxu1 %v775_v14 }
 0x16b   : > { %1163 = vmatprep.subr.mxu1 %v774_v15 }
 0x16c   : > { %1132 = vmatpush3.bf16.msra.mxu0 %v1281_v16  ;;  %1164 = vmatpush3.msra.mxu1 %v774_v15 }
 0x16d   : > { %1165 = vmatprep.subr.mxu1 %v773_v17  ;;  %1133 = vmatprep.subr.bf16.mxu0 %v1380_v44 }
 0x16e   : > { %1166 = vmatpush3.msra.mxu1 %v773_v17 }
 0x16f   : > { %1167 = vmatprep.subr.mxu1 %v772_v18 }
 0x170   : > { %1134 = vmatpush3.bf16.msra.mxu0 %v1282_v19  ;;  %1168 = vmatpush3.msra.mxu1 %v772_v18 }
 0x171   : > { %1169 = vmatprep.subr.mxu1 %v771_v20 }
 0x172   : > { %1170 = vmatpush3.msra.mxu1 %v771_v20 }
 0x173   : > { %1136 = vmatmul.mubr.bf16.vlgmr.msra.gmra.mxu0 %v1612_v62  ;;  %1172 = vmatmul.mubr.f32.vlgmr.msra.gmra.mxu1 %v1606_v60 }
 0x213   : > { %v507_v21 = vpop.f32.mrf.mxu0  ;;  %v714_v22 = vpop.f32.mrf.mxu1 }
 0x214   : > { %516 = vst [vmem:[%s303_s20] sm:$0xff] %v507_v21  ;;  %764 = vst [vmem:[%s1697_s22] sm:$0xff] %v714_v22 }
 0x215   : > { %v509_v23 = vpop.f32.mrf.mxu0  ;;  %v716_v24 = vpop.f32.mrf.mxu1 }
 0x216   : > { %517 = vst [vmem:[%s303_s20 + $0x8] sm:$0xff] %v509_v23  ;;  %765 = vst [vmem:[%s1697_s22 + $0x8] sm:$0xff] %v716_v24 }
 0x217   : > { %v511_v25 = vpop.f32.mrf.mxu0  ;;  %v718_v26 = vpop.f32.mrf.mxu1 }
 0x218   : > { %518 = vst [vmem:[%s303_s20 + $0x10] sm:$0xff] %v511_v25  ;;  %768 = vst [vmem:[%s1697_s22 + $0x18] sm:$0xff] %v718_v26 }
 0x219   : > { %v513_v27 = vpop.f32.mrf.mxu0  ;;  %v720_v28 = vpop.f32.mrf.mxu1 }
 0x21a   : > { %519 = vst [vmem:[%s303_s20 + $0x18] sm:$0xff] %v513_v27  ;;  %769 = vst [vmem:[%s1697_s22 + $0x20] sm:$0xff] %v720_v28 }
 0x21b   : > { %1300 = shalt.err (!%p1297_p3)
}
 0x21c   : > { %s1301_s20 = scalar_lea.hbm %s1707_s26, 512  ;;  %s1305_s25 = scalar_lea.hbm %s1796_s6, 1024 }
 0x21d   : > { %p1302_p4 = scmp.ne.s32.totalorder %s1707_s26, %s1301_s20  ;;  %p1306_p9 = scmp.lt.s32.totalorder %s1707_s26, %s1796_s6 }
 0x21e   : > { %p1307_p10 = scmp.lt.s32.totalorder %s1305_s25, %s1301_s20 }
 0x21f   : > { %p1303_p7 = pnand %p1302_p4, %p1471_p5 }
 0x220   : > { %p1308_p11 = por %p1307_p10, %p1306_p9 }
 0x221   : > { %p1304_p8 = pneg %p1303_p7 }
 0x223   : > { %p1309_p12 = pnand %p1308_p11, %p1304_p8 }
 0x225   : > { %1312 = shalt.err (!%p1309_p12)
}
 0x226   : > { %s1383_s0 = smov 256   ;;  %s1384_s18 = smov 16   ;;  %vm766_vm1 = vcmask 261120   ;;  %vm862_vm2 = vcmask 64512  }
 0x227   : > { %s1804_s13 = scalar_lea.sflag [#allocation3], %s1693_s12  ;;  %s1175_s10 = smul.u32 768, %s1454_s9 }
 0x228   : > { %1176 = dma.vmem_to_hbm [thread:$0]  (%p1471_p5), %s1702_s21, 512, %s1707_s26, %s1804_s13, %s1383_s0, %s1383_s0, %s1384_s18  }
 0x229   : > { %s907_s20 = sshll.u32 %s1697_s22, 4  ;;  %s1805_s23 = sshll.u32 %s1811_s17, 3  ;;  %s1742_s20 = int_to_ptr.vmem [resolvable:$true] %s907_s20 }
 0x22a   : > { %s330_s19 = scalar_lea.vmem %s1798_s8, %s1805_s23  ;;  %s1747_s17 = scalar_lea.hbm %s1797_s7, %s1175_s10 }
 0x22b   : > { %s871_s26 = scalar_lea.sflag [#allocation5], %s1693_s12  ;;  %s1313_s0 = scalar_lea.vmem %s1742_s20, 768 }
 0x22c   : > { %p1314_p13 = scmp.ne.s32.totalorder %s1742_s20, %s1313_s0  ;;  %s1385_s18 = smov [#allocation4]  }
 0x22d   : > { %s1317_s13 = sshll.u32 %s1385_s18, 4  ;;  %s1318_s13 = int_to_ptr.vmem [resolvable:$false] %s1317_s13 }
 0x22e   : > { %p1315_p0 = pnand %p1314_p13, %p1471_p5  ;;  %s1319_s23 = scalar_lea.vmem %s1318_s13, 1536 }
 0x22f   : > { %p1320_p2 = scmp.lt.s32.totalorder %s1742_s20, %s1318_s13  ;;  %p1321_p3 = scmp.lt.s32.totalorder %s1319_s23, %s1313_s0 }
 0x230   : > { %p1316_p1 = pneg %p1315_p0 }
 0x231   : > { %p1322_p4 = por %p1321_p3, %p1320_p2 }
 0x233   : > { %v757_v29 = vpop.f32.mrf.mxu0  ;;  %v1173_v30 = vpop.f32.mrf.mxu1  ;;  %p1323_p7 = pnand %p1322_p4, %p1316_p1 }
 0x234   : > { %767 = vst.msk [vmem:[%s1697_s22 + $0x10] sm:$0xff] %vm766_vm1, %v757_v29 }
 0x235   : > { %v1137_v31 = vpop.f32.mrf.mxu0  ;;  %v853_v32 = vpop.f32.mrf.mxu1  ;;  %864 = vst.msk [vmem:[%s330_s19 + $0x8] sm:$0xff] %vm862_vm2, %v1173_v30 }
 0x236   : > { %863 = vst.msk [vmem:[%s330_s19] sm:$0xff] %vm862_vm2, %v853_v32 }
 0x237   : > { %v760_v33 = vpop.f32.mrf.mxu0 }
 0x238   : > { %770 = vst.msk [vmem:[%s1697_s22 + $0x28] sm:$0xff] %vm766_vm1, %v760_v33 }
 0x239   : > { %v1138_v34 = vpop.f32.mrf.mxu0 }
 0x23a   : > { %1326 = shalt.err (!%p1323_p7)
}
 0x23b   : > { %s1327_s22 = scalar_lea.hbm %s1747_s17, 768  ;;  %s1331_s25 = scalar_lea.hbm %s1797_s7, 1536 }
 0x23c   : > { %p1328_p8 = scmp.ne.s32.totalorder %s1747_s17, %s1327_s22  ;;  %p1332_p11 = scmp.lt.s32.totalorder %s1747_s17, %s1797_s7 }
 0x23d   : > { %p1333_p12 = scmp.lt.s32.totalorder %s1331_s25, %s1327_s22 }
 0x23e   : > { %p1329_p9 = pnand %p1328_p8, %p1471_p5 }
 0x23f   : > { %p1334_p13 = por %p1333_p12, %p1332_p11 }
 0x240   : > { %p1330_p10 = pneg %p1329_p9 }
 0x242   : > { %p1335_p0 = pnand %p1334_p13, %p1330_p10 }
 0x244   : > { %1338 = shalt.err (!%p1335_p0)
}
 0x245   : > { %s1386_s9 = smov 384   ;;  %s1387_s0 = smov 24  }
 0x246   : > { %1177 = dma.vmem_to_hbm [thread:$0]  (%p1471_p5), %s1742_s20, 768, %s1747_s17, %s871_s26, %s1386_s9, %s1386_s9, %s1387_s0  }
 0x247 PF: > { %p1187_p1 = scmp.ge.s32.totalorder %s1377_s30, 2  ;;  %s926_s18 = sand.u32 1, %s1365_s27  }
 0x248   : > { %s927_s13 = scalar_lea.sflag [#allocation3], %s926_s18 }
 0x249   : > { %p1181_p2 = pnand %p1187_p1, %p1475_p6 }
 0x24b   : > { %p1182_p3 = pneg %p1181_p2 }
 0x24d   : > { %1356 = dma.done.wait (%p1182_p3), %s927_s13, 512  }
 0x24e   : > { %1358 = vsyncadd (%p1182_p3), %s927_s13, 4294966784  ;;  %s936_s23 = scalar_lea.sflag [#allocation5], %s926_s18 }
 0x24f   : > { %1360 = dma.done.wait (%p1182_p3), %s936_s23, 768  }
 0x250   : > { %1362 = vsyncadd (%p1182_p3), %s936_s23, 4294966528  ;;  %p22_p5 = scmp.ge.s32.totalorder %s1458_s11, 4   ;;  %s1806_s27 = smov %s1369_s28 }
 0x251   : > { %s1807_s28 = smov %s1373_s29  ;;  %s1808_s29 = smov %s1469_s14 }
 0x252   : > { %s1809_s30 = smov %s1458_s11  ;;  %24 = sbr.rel (!%p22_p5) target bundleno = 7 (0x7), region = 108 }
 0x257   :  { %949 = vsyncpa [#allocation3], 1 }
 0x258   :  { %951 = vsyncpa [#allocation3 + $0x1], 1 }
 0x259   :  { %952 = vsyncpa [#allocation5], 1 }
 0x25a   :  { %954 = vsyncpa [#allocation5 + $0x1], 1 }

</bundles_post_ra>
